<compile_context>
chip_gen: v7x
topology: tpu7x:2x2x1
jax: 0.10.0
libtpu: 0.0.40
codegen_flags: <defaults>
</compile_context>

<pallas_src>
import jax
import jax.numpy as jnp
from jax import lax
from jax.experimental import pallas as pl
from jax.experimental.pallas import tpu as pltpu

_LANE = 128
_BF16_TILE = 16   # bf16 minimum sublane tile is (16, 128)


def _round_up(v, m):
    return ((v + m - 1) // m) * m


def _pad2(a, rows, cols):
    r, c = a.shape
    return jnp.pad(a, ((0, rows - r), (0, cols - c)))


def mlp_kernel(x_ref, w1_ref, b1_ref, w2_ref, b2_ref, w3t_ref, b3t_ref, o_ref):
    # Layer 1: Linear(in_dim -> H1) + bias + ReLU.
    # x arrives f32 / unpadded in K; cast to bf16 on the VPU, f32 MXU accumulate.
    x = x_ref[...].astype(jnp.bfloat16)
    h = jnp.dot(x, w1_ref[...], preferred_element_type=jnp.float32)
    h = jnp.maximum(h + b1_ref[...], 0.0).astype(jnp.bfloat16)
    # Layer 2: Linear(H1 -> H2) + bias + ReLU.
    h = jnp.dot(h, w2_ref[...], preferred_element_type=jnp.float32)
    h = jnp.maximum(h + b2_ref[...], 0.0).astype(jnp.bfloat16)
    # Output layer with BATCH IN LANES: contract w3t (NOr, H2) with h (tm, H2)
    # over H2 -> (NOr, tm).  Only NOr (=8) f32 sublanes are written back per
    # batch tile instead of a 128-wide zero-padded column block.
    o = lax.dot_general(w3t_ref[...], h,
                        dimension_numbers=(((1,), (1,)), ((), ())),
                        preferred_element_type=jnp.float32)
    o_ref[...] = o + b3t_ref[...]


def _batch_tiling(B, tile_batch):
    """Pick (tm, Bp, n_tiles).

    tm is a multiple of 16 (bf16 sublane packing).  For multi-tile grids tm is
    a multiple of 128 so the (NOr, tm) output block is lane-dense, and we use
    >= 2 tiles when B is big enough so the "parallel" grid axis shards across
    both TensorCores on v7x.  n_tiles is re-derived from tm so the trailing
    tile is never entirely padding.
    """
    if B <= 2 * _LANE:
        tm = _round_up(B, _BF16_TILE)
        return tm, tm, 1
    n_tiles = max(pl.cdiv(B, tile_batch), 2)
    tm = _round_up(pl.cdiv(B, n_tiles), _LANE)
    n_tiles = pl.cdiv(B, tm)
    return tm, n_tiles * tm, n_tiles


def mlp_forward(x, params, *, tile_batch=1024):
    """x: (B, input_dim) f32.  params: (in,out) weights and (1,out) biases."""
    B, in_dim = x.shape
    w1, b1 = params["w1"], params["b1"]
    w2, b2 = params["w2"], params["b2"]
    w3, b3 = params["w3"], params["b3"]
    h1, h2 = w1.shape[1], w2.shape[1]
    out_dim = w3.shape[1]

    # Feature padding to lane multiples (zero padding is exact for Linear+ReLU).
    H1 = _round_up(h1, _LANE)
    H2 = _round_up(h2, _LANE)
    NOr = _round_up(out_dim, 8)          # sublane-aligned output rows

    tm, Bp, n_tiles = _batch_tiling(B, tile_batch)

    # Input: batch-pad only; no column padding, no eager bf16 cast in HBM.
    xp = jnp.pad(x, ((0, Bp - B), (0, 0)))

    # Weights / biases (tiny): bf16 MXU feeds, f32 biases.
    w1p = _pad2(w1, in_dim, H1).astype(jnp.bfloat16)
    w2p = _pad2(w2, H1, H2).astype(jnp.bfloat16)
    w3t = _pad2(w3.T, NOr, H2).astype(jnp.bfloat16)   # (out_dim,h2) -> (NOr,H2)
    b1p = _pad2(b1, 1, H1).astype(jnp.float32)
    b2p = _pad2(b2, 1, H2).astype(jnp.float32)
    b3t = _pad2(b3.T, NOr, 1).astype(jnp.float32)     # (out_dim,1) -> (NOr,1)

    def resident(shape):
        # Constant block index -> fetched once, stays resident in VMEM.
        # TODO(synk): single-buffer (pipeline_mode=pl.Buffered(1)) once hidden
        # dims are large enough that double-buffered residents matter for
        # v7x's 64 MiB VMEM.
        return pl.BlockSpec(shape, lambda i: (0, 0))

    out = pl.pallas_call(
        mlp_kernel,
        out_shape=jax.ShapeDtypeStruct((NOr, Bp), jnp.float32),
        grid_spec=pltpu.PrefetchScalarGridSpec(
            num_scalar_prefetch=0,
            grid=(n_tiles,),
            in_specs=[
                pl.BlockSpec((tm, in_dim), lambda i: (i, 0)),   # x (f32)
                resident((in_dim, H1)), resident((1, H1)),      # w1, b1
                resident((H1, H2)), resident((1, H2)),          # w2, b2
                resident((NOr, H2)), resident((NOr, 1)),        # w3^T, b3^T
            ],
            out_specs=pl.BlockSpec((NOr, tm), lambda i: (0, i)),
        ),
        compiler_params=pltpu.CompilerParams(
            dimension_semantics=("parallel",),
            vmem_limit_bytes=32 * 1024 * 1024,
        ),
    )(xp, w1p, b1p, w2p, b2p, w3t, b3t)

    # (NOr, Bp) -> (B, out_dim)
    return out[:out_dim, :B].T


def init_params(key, input_dim, hidden_dims, output_dim=1):
    """Deterministic init mimicking nn.Linear's U(-1/sqrt(in), 1/sqrt(in))."""
    dims = [input_dim] + list(hidden_dims) + [output_dim]
    params = {}
    for idx, (din, dout) in enumerate(zip(dims[:-1], dims[1:]), start=1):
        key, kw, kb = jax.random.split(key, 3)
        bound = 1.0 / jnp.sqrt(jnp.float32(din))
        params[f"w{idx}"] = jax.random.uniform(
            kw, (din, dout), jnp.float32, minval=-bound, maxval=bound)
        params[f"b{idx}"] = jax.random.uniform(
            kb, (1, dout), jnp.float32, minval=-bound, maxval=bound)
    return params


def mlp_reference_f32(x, params):
    h = jnp.maximum(x @ params["w1"] + params["b1"], 0.0)
    h = jnp.maximum(h @ params["w2"] + params["b2"], 0.0)
    return h @ params["w3"] + params["b3"]


def mlp_reference_bf16(x, params):
    """Reference with the same bf16-feed / f32-accumulate recipe as the kernel."""
    bf = lambda a: a.astype(jnp.bfloat16)
    h = jnp.dot(bf(x), bf(params["w1"]),
                preferred_element_type=jnp.float32) + params["b1"]
    h = jnp.maximum(h, 0.0)
    h = jnp.dot(bf(h), bf(params["w2"]),
                preferred_element_type=jnp.float32) + params["b2"]
    h = jnp.maximum(h, 0.0)
    return jnp.dot(bf(h), bf(params["w3"]),
                   preferred_element_type=jnp.float32) + params["b3"]


if __name__ == "__main__":
    key = jax.random.PRNGKey(0)
    batch, input_dim, hidden_dims, output_dim = 16, 16, (32, 32), 1

    kx, kp = jax.random.split(key)
    x = jax.random.normal(kx, (batch, input_dim), jnp.float32)
    params = init_params(kp, input_dim, hidden_dims, output_dim)

    fwd = jax.jit(mlp_forward)   # fuses wrapper-side pads/casts into producers

    out = jax.block_until_ready(fwd(x, params))
    assert out.shape == (batch, output_dim), out.shape

    ref_bf16 = mlp_reference_bf16(x, params)
    ref_f32 = mlp_reference_f32(x, params)
    assert jnp.allclose(out, ref_bf16, atol=1e-3, rtol=1e-3), "mismatch vs bf16 reference"
    assert jnp.allclose(out, ref_f32, atol=5e-2, rtol=5e-2), "mismatch vs f32 reference"

    # Non-divisible batch (exercises wrapper-side batch padding).
    x_odd = jax.random.normal(kx, (13, input_dim), jnp.float32)
    out_odd = jax.block_until_ready(fwd(x_odd, params))
    assert out_odd.shape == (13, output_dim), out_odd.shape
    assert jnp.allclose(out_odd, mlp_reference_bf16(x_odd, params),
                        atol=1e-3, rtol=1e-3), "mismatch on non-divisible batch"

    print("KERNEL_OK")
</pallas_src>

<mosaic_0001>
module attributes {stable_mosaic.version = 11 : i64} {
  func.func @mlp_kernel(%arg0: i32, %arg1: memref<16x16xf32, #tpu.memory_space<vmem>>, %arg2: memref<16x128xbf16, #tpu.memory_space<vmem>>, %arg3: memref<1x128xf32, #tpu.memory_space<vmem>>, %arg4: memref<128x128xbf16, #tpu.memory_space<vmem>>, %arg5: memref<1x128xf32, #tpu.memory_space<vmem>>, %arg6: memref<8x128xbf16, #tpu.memory_space<vmem>>, %arg7: memref<8x1xf32, #tpu.memory_space<vmem>>, %arg8: memref<8x16xf32, #tpu.memory_space<vmem>>) attributes {dimension_semantics = [#tpu.dimension_semantics<parallel>], iteration_bounds = array<i64: 1>, scalar_prefetch = 0 : i64, scratch_operands = 0 : i64, tpu.core_type = #tpu.core_type<tc>, window_params = [{transform_indices = @transform_0, window_bounds = array<i64: 16, 16>}, {pipeline_mode = #tpu.pipeline_mode<synchronous>, transform_indices = @transform_1, window_bounds = array<i64: 16, 128>}, {pipeline_mode = #tpu.pipeline_mode<synchronous>, transform_indices = @transform_2, window_bounds = array<i64: 1, 128>}, {pipeline_mode = #tpu.pipeline_mode<synchronous>, transform_indices = @transform_3, window_bounds = array<i64: 128, 128>}, {pipeline_mode = #tpu.pipeline_mode<synchronous>, transform_indices = @transform_4, window_bounds = array<i64: 1, 128>}, {pipeline_mode = #tpu.pipeline_mode<synchronous>, transform_indices = @transform_5, window_bounds = array<i64: 8, 128>}, {pipeline_mode = #tpu.pipeline_mode<synchronous>, transform_indices = @transform_6, window_bounds = array<i64: 8, 1>}, {transform_indices = @transform_7, window_bounds = array<i64: 8, 16>}]} {
    %c0 = arith.constant 0 : index
    %c0_0 = arith.constant 0 : index
    %0 = vector.load %arg1[%c0, %c0_0] : memref<16x16xf32, #tpu.memory_space<vmem>>, vector<16x16xf32>
    %1 = arith.truncf %0 : vector<16x16xf32> to vector<16x16xbf16>
    %c0_1 = arith.constant 0 : index
    %c0_2 = arith.constant 0 : index
    %2 = vector.load %arg2[%c0_1, %c0_2] : memref<16x128xbf16, #tpu.memory_space<vmem>>, vector<16x128xbf16>
    %cst = arith.constant dense<0.000000e+00> : vector<16x128xf32>
    %3 = tpu.matmul %1, %2, %cst {dimension_numbers = #tpu.dot_dimension_numbers<[1], [0], [0], [1], [0, 0, 1, 1], [], []>} : vector<16x16xbf16>, vector<16x128xbf16>, vector<16x128xf32> -> vector<16x128xf32>
    %c0_3 = arith.constant 0 : index
    %c0_4 = arith.constant 0 : index
    %4 = vector.load %arg3[%c0_3, %c0_4] : memref<1x128xf32, #tpu.memory_space<vmem>>, vector<1x128xf32>
    %5 = vector.broadcast %4 : vector<1x128xf32> to vector<16x128xf32>
    %6 = arith.addf %3, %5 : vector<16x128xf32>
    %cst_5 = arith.constant 0.000000e+00 : f32
    %7 = vector.broadcast %cst_5 : f32 to vector<16x128xf32>
    %8 = arith.maximumf %6, %7 : vector<16x128xf32>
    %9 = arith.truncf %8 : vector<16x128xf32> to vector<16x128xbf16>
    %c0_6 = arith.constant 0 : index
    %c0_7 = arith.constant 0 : index
    %10 = vector.load %arg4[%c0_6, %c0_7] : memref<128x128xbf16, #tpu.memory_space<vmem>>, vector<128x128xbf16>
    %cst_8 = arith.constant dense<0.000000e+00> : vector<16x128xf32>
    %11 = tpu.matmul %9, %10, %cst_8 {dimension_numbers = #tpu.dot_dimension_numbers<[1], [0], [0], [1], [0, 0, 1, 1], [], []>} : vector<16x128xbf16>, vector<128x128xbf16>, vector<16x128xf32> -> vector<16x128xf32>
    %c0_9 = arith.constant 0 : index
    %c0_10 = arith.constant 0 : index
    %12 = vector.load %arg5[%c0_9, %c0_10] : memref<1x128xf32, #tpu.memory_space<vmem>>, vector<1x128xf32>
    %13 = vector.broadcast %12 : vector<1x128xf32> to vector<16x128xf32>
    %14 = arith.addf %11, %13 : vector<16x128xf32>
    %cst_11 = arith.constant 0.000000e+00 : f32
    %15 = vector.broadcast %cst_11 : f32 to vector<16x128xf32>
    %16 = arith.maximumf %14, %15 : vector<16x128xf32>
    %17 = arith.truncf %16 : vector<16x128xf32> to vector<16x128xbf16>
    %c0_12 = arith.constant 0 : index
    %c0_13 = arith.constant 0 : index
    %18 = vector.load %arg6[%c0_12, %c0_13] : memref<8x128xbf16, #tpu.memory_space<vmem>>, vector<8x128xbf16>
    %cst_14 = arith.constant dense<0.000000e+00> : vector<8x16xf32>
    %19 = tpu.matmul %18, %17, %cst_14 {dimension_numbers = #tpu.dot_dimension_numbers<[1], [1], [0], [0], [0, 0, 1, 0], [], []>} : vector<8x128xbf16>, vector<16x128xbf16>, vector<8x16xf32> -> vector<8x16xf32>
    %c0_15 = arith.constant 0 : index
    %c0_16 = arith.constant 0 : index
    %20 = vector.load %arg7[%c0_15, %c0_16] : memref<8x1xf32, #tpu.memory_space<vmem>>, vector<8x1xf32>
    %21 = vector.broadcast %20 : vector<8x1xf32> to vector<8x16xf32>
    %22 = arith.addf %19, %21 : vector<8x16xf32>
    %c0_17 = arith.constant 0 : index
    %c0_18 = arith.constant 0 : index
    %23 = vector.load %arg8[%c0_17, %c0_18] : memref<8x16xf32, #tpu.memory_space<vmem>>, vector<8x16xf32>
    tpu.vector_store %arg8[%c0_17, %c0_18], %22 {strides = array<i32>} : memref<8x16xf32, #tpu.memory_space<vmem>>, vector<8x16xf32>,
    return
  }
  func.func @transform_0(%arg0: i32) -> (i32, i32) {
    %c0_i32 = arith.constant 0 : i32
    %c0_i32_0 = arith.constant 0 : i32
    return %arg0, %c0_i32 : i32, i32
  }
  func.func @transform_1(%arg0: i32) -> (i32, i32) {
    %c0_i32 = arith.constant 0 : i32
    %c0_i32_0 = arith.constant 0 : i32
    %c0_i32_1 = arith.constant 0 : i32
    return %c0_i32, %c0_i32_0 : i32, i32
  }
  func.func @transform_2(%arg0: i32) -> (i32, i32) {
    %c0_i32 = arith.constant 0 : i32
    %c0_i32_0 = arith.constant 0 : i32
    %c0_i32_1 = arith.constant 0 : i32
    return %c0_i32, %c0_i32_0 : i32, i32
  }
  func.func @transform_3(%arg0: i32) -> (i32, i32) {
    %c0_i32 = arith.constant 0 : i32
    %c0_i32_0 = arith.constant 0 : i32
    %c0_i32_1 = arith.constant 0 : i32
    return %c0_i32, %c0_i32_0 : i32, i32
  }
  func.func @transform_4(%arg0: i32) -> (i32, i32) {
    %c0_i32 = arith.constant 0 : i32
    %c0_i32_0 = arith.constant 0 : i32
    %c0_i32_1 = arith.constant 0 : i32
    return %c0_i32, %c0_i32_0 : i32, i32
  }
  func.func @transform_5(%arg0: i32) -> (i32, i32) {
    %c0_i32 = arith.constant 0 : i32
    %c0_i32_0 = arith.constant 0 : i32
    %c0_i32_1 = arith.constant 0 : i32
    return %c0_i32, %c0_i32_0 : i32, i32
  }
  func.func @transform_6(%arg0: i32) -> (i32, i32) {
    %c0_i32 = arith.constant 0 : i32
    %c0_i32_0 = arith.constant 0 : i32
    %c0_i32_1 = arith.constant 0 : i32
    return %c0_i32, %c0_i32_0 : i32, i32
  }
  func.func @transform_7(%arg0: i32) -> (i32, i32) {
    %c0_i32 = arith.constant 0 : i32
    %c0_i32_0 = arith.constant 0 : i32
    return %c0_i32, %arg0 : i32, i32
  }
}

</mosaic_0001>

<bundles_post_ra>
// kernel: mlp_forward.1
= control target key start
LH: loop header
LB: loop body
LE: loop exit
PB: predicated region body
PF: predicated region fallthrough
CT: control target
= control target key end

     0   :  { %v330_v0 = vmov 0.0   ;;  %vm331_vm0 = vmmov 0   ;;  %vm45_vm1 = vcmask 130048   ;;  %v332_v23 = vmov 0   ;;  %s423_s1 = inlined_call_operand.vmem [shape: bf16[16,128], index: 1, kind: input, shape index: {}]   ;;  %s424_s0 = inlined_call_operand.vmem [shape: f32[16,16], index: 0, kind: input, shape index: {}]   ;;  %s425_s3 = inlined_call_operand.vmem [shape: bf16[128,128], index: 3, kind: input, shape index: {}]   ;;  %s426_s2 = inlined_call_operand.vmem [shape: f32[1,128], index: 2, kind: input, shape index: {}]   ;;  %s427_s6 = inlined_call_operand.vmem [shape: f32[8,1], index: 6, kind: input, shape index: {}]   ;;  %s428_s4 = inlined_call_operand.vmem [shape: f32[1,128], index: 4, kind: input, shape index: {}]   ;;  %s429_s5 = inlined_call_operand.vmem [shape: bf16[8,128], index: 5, kind: input, shape index: {}]   ;;  %s430_s7 = inlined_call_operand.vmem [shape: f32[8,16], index: 7, kind: output, shape index: {}]  }
   0x1   :  { %285 = vmatprep.subr.bf16.mxu0 %v330_v0  ;;  %v321_v1 = vld [vmem:[%s423_s1] sm:$0xff]   ;;  %287 = vmatprep.mubr.msk.bf16.mxu0 %vm331_vm0, %v330_v0  ;;  %v28_v3 = vld [vmem:[%s424_s0 + $0x8] sm:$0xff]  ;;  %v324_v7 = vld [vmem:[%s425_s3 + $0x10] sm:$0xff]  }
   0x2   :  { %v27_v2 = vld [vmem:[%s424_s0] sm:$0xff]  ;;  %291 = vmatprep.subr.bf16.mxu1 %v330_v0  ;;  %307 = vmatprep.mubr.msk.bf16.mxu1 %vm331_vm0, %v330_v0  ;;  %v323_v6 = vld [vmem:[%s425_s3 + $0x8] sm:$0xff]   ;;  %v325_v8 = vld [vmem:[%s425_s3 + $0x18] sm:$0xff]  }
   0x3   :  { %286 = vmatpush3.bf16.msra.mxu0 %v321_v1  ;;  %v29_v4 = vpack.c.bf16 %v28_v3, %v27_v2  ;;  %v322_v5 = vld [vmem:[%s425_s3] sm:$0xff]   ;;  %v327_v10 = vld [vmem:[%s425_s3 + $0x28] sm:$0xff]   ;;  %v328_v11 = vld [vmem:[%s425_s3 + $0x30] sm:$0xff]   ;;  %320 = vset.pattern.permute.xlu0 %v332_v23 }
   0x4   :  { %311 = vmatprep.subr.bf16.mxu0 %v330_v0  ;;  %292 = vmatpush3.bf16.msra.mxu1 %v322_v5  ;;  %v326_v9 = vld [vmem:[%s425_s3 + $0x20] sm:$0xff]   ;;  %v329_v12 = vld [vmem:[%s425_s3 + $0x38] sm:$0xff]  }
   0x5   :  { %293 = vmatprep.subr.bf16.mxu1 %v330_v0  ;;  %v260_v13 = vld [vmem:[%s426_s2] ss:$0 sm:$0xff] }
   0x6   :  { %288 = vmatmul.mubr.msk.bf16.vlgmr.msra.gmra.mrb[0].mxu0 %vm45_vm1, %v29_v4  ;;  %v209_v24 = vld [vmem:[%s427_s6] sm:$0xff] }
   0x7   :  { %313 = vmatprep.mubr.msk.bf16.mxu0 %vm331_vm0, %v330_v0  ;;  %212 = vperm.xlu0 %320, %v209_v24   ;;  %v263_v25 = vld [vmem:[%s428_s4] ss:$0 sm:$0xff] }
   0x8   :  { %294 = vmatpush3.bf16.msra.mxu1 %v323_v6  ;;  %v208_v35 = vld [vmem:[%s429_s5] sm:$0xf] }
   0x9   :  { %295 = vmatprep.subr.bf16.mxu1 %v330_v0 }
   0xc   :  { %296 = vmatpush3.bf16.msra.mxu1 %v324_v7 }
   0xd   :  { %297 = vmatprep.subr.bf16.mxu1 %v330_v0 }
  0x10   :  { %298 = vmatpush3.bf16.msra.mxu1 %v325_v8 }
  0x11   :  { %299 = vmatprep.subr.bf16.mxu1 %v330_v0 }
  0x14   :  { %300 = vmatpush3.bf16.msra.mxu1 %v326_v9 }
  0x15   :  { %301 = vmatprep.subr.bf16.mxu1 %v330_v0 }
  0x18   :  { %302 = vmatpush3.bf16.msra.mxu1 %v327_v10 }
  0x19   :  { %303 = vmatprep.subr.bf16.mxu1 %v330_v0 }
  0x1c   :  { %304 = vmatpush3.bf16.msra.mxu1 %v328_v11 }
  0x1d   :  { %305 = vmatprep.subr.bf16.mxu1 %v330_v0 }
  0x20   :  { %306 = vmatpush3.bf16.msra.mxu1 %v329_v12 }
  0x86   :  { %v213_v36 = vpop.permute.xlu0 %212 }
  0xd9   :  { %v83_v14 = vpop.f32.mrb[0].mxu0 }
  0xda   :  { %v84_v15 = vadd.f32 %v260_v13, %v83_v14  ;;  %v289_v16 = vpop.f32.mrb[1].mxu0 }
  0xdb   :  { %v86_v17 = vpop.f32.mrb[2].mxu0 }
  0xdc   :  { %v87_v18 = vadd.f32 %v260_v13, %v86_v17  ;;  %v290_v19 = vpop.f32.mrb[3].mxu0  ;;  %v90_v20 = vmax.f32 %v84_v15, 0.0 }
  0xde   :  { %v91_v21 = vmax.f32 %v87_v18, 0.0 }
  0xe0   :  { %v92_v22 = vpack.c.bf16 %v91_v21, %v90_v20 }
  0xe2   :  { %308 = vmatmul.mubr.bf16.vlgmr.msra.gmra.mrb[0].mxu1 %v92_v22 }
 0x1b5   :  { %v198_v26 = vpop.f32.mrb[0].mxu1 }
 0x1b6   :  { %v199_v27 = vadd.f32 %v263_v25, %v198_v26  ;;  %v309_v28 = vpop.f32.mrb[1].mxu1 }
 0x1b7   :  { %v201_v29 = vpop.f32.mrb[2].mxu1 }
 0x1b8   :  { %v202_v30 = vadd.f32 %v263_v25, %v201_v29  ;;  %v310_v31 = vpop.f32.mrb[3].mxu1  ;;  %v205_v32 = vmax.f32 %v199_v27, 0.0 }
 0x1ba   :  { %v206_v33 = vmax.f32 %v202_v30, 0.0 }
 0x1bc   :  { %v207_v34 = vpack.c.bf16 %v206_v33, %v205_v32 }
 0x1be   :  { %312 = vmatpush3.bf16.xpose.msra.mxu0 %v207_v34 }
 0x1c5   :  { %314 = vmatmul.mubr.bf16.vlgmr.msra.gmra.mrb[4].mxu0 %v208_v35 }
 0x298   :  { %v249_v37 = vpop.f32.mrb[4].mxu0 }
 0x299   :  { %v250_v38 = vadd.f32 %v249_v37, %v213_v36  ;;  %v315_v39 = vpop.f32.mrb[5].mxu0 }
 0x29a   :  { %v252_v40 = vpop.f32.mrb[6].mxu0 }
 0x29b   :  { %255 = vst.msk [vmem:[%s430_s7] sm:$0xff] %vm45_vm1, %v250_v38  ;;  %v316_v41 = vpop.f32.mrb[7].mxu0 }

</bundles_post_ra>
